<compile_context>
chip_gen: v7x
topology: tpu7x:2x2x1
jax: 0.10.0
libtpu: 0.0.40
codegen_flags: <defaults>
</compile_context>

<pallas_src>
import math

import jax
import jax.numpy as jnp
from jax.experimental import pallas as pl
from jax.experimental.pallas import tpu as pltpu


def _round_up(v, m):
    return (v + m - 1) // m * m


def mgc_kernel(x_ref, w1_ref, b1_ref, w2_ref, b2_ref, o_ref):
    # --- graph_aug_linear: x @ W1 + b1 (bf16 inputs, f32 MXU accumulation) ---
    h = jnp.dot(x_ref[...], w1_ref[...], preferred_element_type=jnp.float32)
    h = h + b1_ref[...]

    # --- RGTEU activation (tanh approximation of GELU), f32 element-wise ---
    # TODO(synk): RGTEU assumed to be the real Gaussian-Tanh-Error Unit, i.e.
    # 0.5*x*(1 + tanh(sqrt(2/pi)*(x + 0.044715*x^3))).
    c = jnp.float32(math.sqrt(2.0 / math.pi))
    h2 = h * h                                      # reused: one fewer vmul
    inner = c * h * (1.0 + jnp.float32(0.044715) * h2)
    h = 0.5 * h * (1.0 + jnp.tanh(inner))

    # --- dropout: eval mode -> identity (training-mode masking not applied) ---

    # --- classifier: h @ W2 + b2 (bf16 inputs, f32 accumulation) ---
    logits = jnp.dot(h.astype(w2_ref.dtype), w2_ref[...],
                     preferred_element_type=jnp.float32)
    logits = logits + b2_ref[...]                   # padded classes carry -1e30 bias

    # --- log_softmax over the (lane-dense, padded) class dim, f32 math ---
    m = jnp.max(logits, axis=-1, keepdims=True)
    z = logits - m
    lse = jnp.log(jnp.sum(jnp.exp(z), axis=-1, keepdims=True))
    o_ref[...] = (z - lse).astype(o_ref.dtype)


def _tpu_vmem_and_cores():
    """(physical VMEM per TensorCore, TensorCores per chip) with safe fallbacks."""
    vmem = 128 * 2**20
    cores = 1
    try:
        info = pltpu.get_tpu_info()
        vmem = int(getattr(info, "vmem_capacity_bytes", vmem))
    except Exception:
        pass
    if vmem <= 64 * 2**20:      # v7x: 64 MiB VMEM per TC, 2 TCs/chip
        cores = 2
    return vmem, cores


class MGCPallas:
    """Eval-mode MGC forward (real branch). Weights are padded/cast once at init."""

    def __init__(self, w1, b1, w2, b2, *, tile_m=None, out_dtype=jnp.float32):
        n_feat, n_hid = w1.shape
        n_class = w2.shape[1]
        self.n_feat, self.n_hid, self.n_class = n_feat, n_hid, n_class
        # out_dtype=jnp.bfloat16 halves output writeback if bf16 log-probs suffice.
        self.out_dtype = out_dtype

        # 128-align all lane / contraction dims.
        self.K = _round_up(n_feat, 128)
        self.H = _round_up(n_hid, 128)
        self.C = _round_up(n_class, 128)
        K, H, C = self.K, self.H, self.C

        # Pad + cast ONCE (no per-call weight traffic).  Zero-padded x columns /
        # W1 rows-cols / W2 rows keep the math exact; padded class columns get a
        # -1e30 bias so they contribute ~0 to the softmax normalizer.
        f32, bf16 = jnp.float32, jnp.bfloat16
        w1p = jnp.zeros((K, H), bf16).at[:n_feat, :n_hid].set(w1.astype(bf16))
        b1p = jnp.zeros((1, H), f32).at[:, :n_hid].set(
            jnp.reshape(b1.astype(f32), (1, n_hid)))
        w2p = jnp.zeros((H, C), bf16).at[:n_hid, :n_class].set(w2.astype(bf16))
        b2p = jnp.full((1, C), -1e30, f32).at[:, :n_class].set(
            jnp.reshape(b2.astype(f32), (1, n_class)))
        self._params = tuple(jax.block_until_ready(p) for p in (w1p, b1p, w2p, b2p))

        self._vmem_phys, self._n_cores = _tpu_vmem_and_cores()
        self._is_small_vmem = self._vmem_phys <= 64 * 2**20   # v7x-like
        if tile_m is None:
            tile_m = 256 if self._is_small_vmem else 512
        self._tile_m = max(8, (int(tile_m) // 8) * 8)
        self._cache = {}

    # ---------------- tiling / VMEM bookkeeping ----------------
    def _vmem_need(self, tm, weight_bufs):
        K, H, C = self.K, self.H, self.C
        out_b = jnp.dtype(self.out_dtype).itemsize
        return (2 * tm * K * 2                       # x tile, double-buffered (bf16)
                + 2 * tm * C * out_b                 # out tile, double-buffered
                + weight_bufs * (K * H + H * C) * 2  # weights (bf16)
                + weight_bufs * (H + C) * 4          # biases (f32)
                + 3 * tm * H * 4                     # h + GELU temporaries (f32)
                + 3 * tm * C * 4)                    # logits / exp / store staging (f32)

    def _vmem_cap(self):
        # Headroom under 64 MiB physical on v7x; use the larger VMEM on v5e/v6e.
        return int(52 * 2**20) if self._is_small_vmem else int(100 * 2**20)

    def _choose_row_tiling(self, N, weight_bufs):
        cap = self._vmem_cap()
        tm_cap = self._tile_m
        # Shrink the row tile until the per-tile working set fits comfortably.
        while tm_cap > 128 and self._vmem_need(tm_cap, weight_bufs) > int(0.8 * cap):
            tm_cap = max(128, (tm_cap // 2 // 8) * 8)

        n8 = _round_up(max(N, 1), 8)
        max_steps = n8 // 8
        steps = pl.cdiv(n8, tm_cap)
        if self._n_cores >= 2:
            # >= 2 steps per TensorCore so x-DMA / output writeback overlap compute.
            steps = max(steps, min(2 * self._n_cores, max_steps))
        steps = max(1, min(steps, max_steps))
        tm = _round_up(pl.cdiv(n8, steps), 8)        # balanced tiles: <8 padded rows
        steps = pl.cdiv(n8, tm)
        if self._n_cores >= 2 and steps > 1:
            steps = _round_up(steps, self._n_cores)
        M = steps * tm
        return tm, M

    # ---------------- pallas_call construction ----------------
    def _build_pallas_call(self, M, tm, use_buffered):
        K, H, C = self.K, self.H, self.C
        weight_bufs = 1 if use_buffered else 2

        def const_spec(shape):
            if use_buffered:
                # Constant-index blocks: single buffer (index map is always (0,0)),
                # halving the resident weight footprint.
                return pl.BlockSpec(shape, lambda i: (0, 0),
                                    pipeline_mode=pl.Buffered(1))
            return pl.BlockSpec(shape, lambda i: (0, 0))

        out_b = jnp.dtype(self.out_dtype).itemsize
        cost = pl.CostEstimate(
            flops=2 * M * (K * H + H * C),
            transcendentals=M * (H + C),
            bytes_accessed=(M * K + K * H + H * C) * 2 + (H + C) * 4 + M * C * out_b)

        vmem_limit = int(min(self._vmem_cap(),
                             max(32 * 2**20,
                                 int(1.5 * self._vmem_need(tm, weight_bufs)))))

        # TODO(synk): for very large n_feat/n_hid (whole weights approaching ~40 MiB)
        # add a K-reduction grid axis ("arbitrary", last) with an f32 VMEM accumulator
        # instead of keeping both weight matrices fully resident (matters on v7x).
        return pl.pallas_call(
            mgc_kernel,
            out_shape=jax.ShapeDtypeStruct((M, C), self.out_dtype),
            grid_spec=pltpu.PrefetchScalarGridSpec(
                num_scalar_prefetch=0,
                grid=(M // tm,),
                in_specs=[
                    pl.BlockSpec((tm, K), lambda i: (i, 0)),   # x tile (bf16)
                    const_spec((K, H)),                        # W1 (bf16)
                    const_spec((1, H)),                        # b1 (f32)
                    const_spec((H, C)),                        # W2 (bf16)
                    const_spec((1, C)),                        # b2 (f32, -1e30 pad)
                ],
                out_specs=pl.BlockSpec((tm, C), lambda i: (i, 0)),  # lane-dense, 128-wide
            ),
            compiler_params=pltpu.CompilerParams(
                dimension_semantics=("parallel",),
                vmem_limit_bytes=vmem_limit),
            cost_estimate=cost,
        )

    def _build_forward(self, N, use_buffered):
        weight_bufs = 1 if use_buffered else 2
        tm, M = self._choose_row_tiling(N, weight_bufs)
        call = self._build_pallas_call(M, tm, use_buffered)
        n_feat, n_class, K = self.n_feat, self.n_class, self.K

        def fwd(x, w1p, b1p, w2p, b2p):
            # Per-call work: only pad/cast the activations; weights are pre-padded.
            xp = jnp.zeros((M, K), jnp.bfloat16).at[:N, :n_feat].set(
                x.astype(jnp.bfloat16))
            out = call(xp, w1p, b1p, w2p, b2p)
            return out[:N, :n_class]

        return jax.jit(fwd)

    def __call__(self, x):
        N = x.shape[0]
        fwd = self._cache.get(N)
        if fwd is not None:
            return fwd(x, *self._params)
        try:
            fwd = self._build_forward(N, use_buffered=True)
            out = fwd(x, *self._params)
        except Exception:
            # Fallback for JAX versions without BlockSpec(pipeline_mode=pl.Buffered).
            fwd = self._build_forward(N, use_buffered=False)
            out = fwd(x, *self._params)
        self._cache[N] = fwd
        return out


def _reference(x, w1, b1, w2, b2):
    c = math.sqrt(2.0 / math.pi)
    h = x @ w1 + b1.reshape(1, -1)
    h = 0.5 * h * (1.0 + jnp.tanh(c * (h + 0.044715 * h ** 3)))
    logits = h @ w2 + b2.reshape(1, -1)
    return jax.nn.log_softmax(logits, axis=-1)


if __name__ == "__main__":
    # Small, MGC-consistent shapes: N nodes, n_feat -> n_hid -> n_class.
    N, n_feat, n_hid, n_class = 16, 32, 32, 8
    enable_bias = True

    key = jax.random.PRNGKey(0)
    kx, kw1, kb1, kw2, kb2 = jax.random.split(key, 5)

    x = jax.random.normal(kx, (N, n_feat), dtype=jnp.float32)

    # Deterministic synthetic params (torch.nn.Linear-shaped, stored transposed).
    w1 = jax.random.normal(kw1, (n_feat, n_hid), dtype=jnp.float32) * (1.0 / math.sqrt(n_feat))
    b1 = (jax.random.normal(kb1, (1, n_hid), dtype=jnp.float32) * 0.01) if enable_bias \
        else jnp.zeros((1, n_hid), jnp.float32)
    w2 = jax.random.normal(kw2, (n_hid, n_class), dtype=jnp.float32) * (1.0 / math.sqrt(n_hid))
    b2 = (jax.random.normal(kb2, (1, n_class), dtype=jnp.float32) * 0.01) if enable_bias \
        else jnp.zeros((1, n_class), jnp.float32)

    model = MGCPallas(w1, b1, w2, b2)     # weights padded / cast to bf16 once here
    out = jax.block_until_ready(model(x))
    assert out.shape == (N, n_class)

    # Sanity 1: log_softmax rows must sum to ~1 in prob space.
    row_sums = jnp.sum(jnp.exp(out), axis=-1)
    assert bool(jnp.all(jnp.abs(row_sums - 1.0) < 1e-4))

    # Sanity 2: match a pure-JAX f32 reference (bf16 matmul inputs -> loose tol).
    ref = _reference(x, w1, b1, w2, b2)
    assert bool(jnp.max(jnp.abs(out - ref)) < 1e-1)

    # Sanity 3: second call reuses the cached compiled forward (no re-padding of weights).
    out2 = jax.block_until_ready(model(x))
    assert bool(jnp.max(jnp.abs(out2 - out)) == 0.0)

    print("KERNEL_OK")
</pallas_src>

<mosaic_0001>
module attributes {stable_mosaic.version = 11 : i64} {
  func.func @mgc_kernel(%arg0: i32, %arg1: memref<16x128xbf16, #tpu.memory_space<vmem>>, %arg2: memref<128x128xbf16, #tpu.memory_space<vmem>>, %arg3: memref<1x128xf32, #tpu.memory_space<vmem>>, %arg4: memref<128x128xbf16, #tpu.memory_space<vmem>>, %arg5: memref<1x128xf32, #tpu.memory_space<vmem>>, %arg6: memref<16x128xf32, #tpu.memory_space<vmem>>) attributes {dimension_semantics = [#tpu.dimension_semantics<parallel>], iteration_bounds = array<i64: 1>, scalar_prefetch = 0 : i64, scratch_operands = 0 : i64, tpu.core_type = #tpu.core_type<tc>, window_params = [{transform_indices = @transform_0, window_bounds = array<i64: 16, 128>}, {pipeline_mode = #tpu.pipeline_mode<synchronous>, transform_indices = @transform_1, window_bounds = array<i64: 128, 128>}, {pipeline_mode = #tpu.pipeline_mode<synchronous>, transform_indices = @transform_2, window_bounds = array<i64: 1, 128>}, {pipeline_mode = #tpu.pipeline_mode<synchronous>, transform_indices = @transform_3, window_bounds = array<i64: 128, 128>}, {pipeline_mode = #tpu.pipeline_mode<synchronous>, transform_indices = @transform_4, window_bounds = array<i64: 1, 128>}, {transform_indices = @transform_5, window_bounds = array<i64: 16, 128>}]} {
    %c0 = arith.constant 0 : index
    %c0_0 = arith.constant 0 : index
    %0 = vector.load %arg1[%c0, %c0_0] : memref<16x128xbf16, #tpu.memory_space<vmem>>, vector<16x128xbf16>
    %c0_1 = arith.constant 0 : index
    %c0_2 = arith.constant 0 : index
    %1 = vector.load %arg2[%c0_1, %c0_2] : memref<128x128xbf16, #tpu.memory_space<vmem>>, vector<128x128xbf16>
    %cst = arith.constant dense<0.000000e+00> : vector<16x128xf32>
    %2 = tpu.matmul %0, %1, %cst {dimension_numbers = #tpu.dot_dimension_numbers<[1], [0], [0], [1], [0, 0, 1, 1], [], []>} : vector<16x128xbf16>, vector<128x128xbf16>, vector<16x128xf32> -> vector<16x128xf32>
    %c0_3 = arith.constant 0 : index
    %c0_4 = arith.constant 0 : index
    %3 = vector.load %arg3[%c0_3, %c0_4] : memref<1x128xf32, #tpu.memory_space<vmem>>, vector<1x128xf32>
    %4 = vector.broadcast %3 : vector<1x128xf32> to vector<16x128xf32>
    %5 = arith.addf %2, %4 : vector<16x128xf32>
    %6 = arith.mulf %5, %5 : vector<16x128xf32>
    %cst_5 = arith.constant 0.797884583 : f32
    %7 = vector.broadcast %cst_5 : f32 to vector<16x128xf32>
    %8 = arith.mulf %7, %5 : vector<16x128xf32>
    %cst_6 = arith.constant 4.471500e-02 : f32
    %9 = vector.broadcast %cst_6 : f32 to vector<16x128xf32>
    %10 = arith.mulf %9, %6 : vector<16x128xf32>
    %cst_7 = arith.constant 1.000000e+00 : f32
    %11 = vector.broadcast %cst_7 : f32 to vector<16x128xf32>
    %12 = arith.addf %11, %10 : vector<16x128xf32>
    %13 = arith.mulf %8, %12 : vector<16x128xf32>
    %cst_8 = arith.constant 5.000000e-01 : f32
    %14 = vector.broadcast %cst_8 : f32 to vector<16x128xf32>
    %15 = arith.mulf %14, %5 : vector<16x128xf32>
    %16 = math.tanh %13 : vector<16x128xf32>
    %cst_9 = arith.constant 1.000000e+00 : f32
    %17 = vector.broadcast %cst_9 : f32 to vector<16x128xf32>
    %18 = arith.addf %17, %16 : vector<16x128xf32>
    %19 = arith.mulf %15, %18 : vector<16x128xf32>
    %20 = arith.truncf %19 : vector<16x128xf32> to vector<16x128xbf16>
    %c0_10 = arith.constant 0 : index
    %c0_11 = arith.constant 0 : index
    %21 = vector.load %arg4[%c0_10, %c0_11] : memref<128x128xbf16, #tpu.memory_space<vmem>>, vector<128x128xbf16>
    %cst_12 = arith.constant dense<0.000000e+00> : vector<16x128xf32>
    %22 = tpu.matmul %20, %21, %cst_12 {dimension_numbers = #tpu.dot_dimension_numbers<[1], [0], [0], [1], [0, 0, 1, 1], [], []>} : vector<16x128xbf16>, vector<128x128xbf16>, vector<16x128xf32> -> vector<16x128xf32>
    %c0_13 = arith.constant 0 : index
    %c0_14 = arith.constant 0 : index
    %23 = vector.load %arg5[%c0_13, %c0_14] : memref<1x128xf32, #tpu.memory_space<vmem>>, vector<1x128xf32>
    %24 = vector.broadcast %23 : vector<1x128xf32> to vector<16x128xf32>
    %25 = arith.addf %22, %24 : vector<16x128xf32>
    %cst_15 = arith.constant dense<0xFF800000> : vector<16xf32>
    %26 = vector.multi_reduction <maximumf>, %25, %cst_15 [1] : vector<16x128xf32> to vector<16xf32>
    %27 = vector.shape_cast %26 : vector<16xf32> to vector<16x1xf32>
    %28 = vector.broadcast %27 : vector<16x1xf32> to vector<16x128xf32>
    %29 = arith.subf %25, %28 : vector<16x128xf32>
    %30 = math.exp %29 : vector<16x128xf32>
    %cst_16 = arith.constant dense<0.000000e+00> : vector<16xf32>
    %31 = vector.multi_reduction <add>, %30, %cst_16 [1] : vector<16x128xf32> to vector<16xf32>
    %32 = vector.shape_cast %31 : vector<16xf32> to vector<16x1xf32>
    %33 = math.log %32 : vector<16x1xf32>
    %34 = vector.broadcast %33 : vector<16x1xf32> to vector<16x128xf32>
    %35 = arith.subf %29, %34 : vector<16x128xf32>
    %c0_17 = arith.constant 0 : index
    %c0_18 = arith.constant 0 : index
    %36 = vector.load %arg6[%c0_17, %c0_18] : memref<16x128xf32, #tpu.memory_space<vmem>>, vector<16x128xf32>
    tpu.vector_store %arg6[%c0_17, %c0_18], %35 {strides = array<i32>} : memref<16x128xf32, #tpu.memory_space<vmem>>, vector<16x128xf32>,
    return
  }
  func.func @transform_0(%arg0: i32) -> (i32, i32) {
    %c0_i32 = arith.constant 0 : i32
    %c0_i32_0 = arith.constant 0 : i32
    return %arg0, %c0_i32 : i32, i32
  }
  func.func @transform_1(%arg0: i32) -> (i32, i32) {
    %c0_i32 = arith.constant 0 : i32
    %c0_i32_0 = arith.constant 0 : i32
    %c0_i32_1 = arith.constant 0 : i32
    return %c0_i32, %c0_i32_0 : i32, i32
  }
  func.func @transform_2(%arg0: i32) -> (i32, i32) {
    %c0_i32 = arith.constant 0 : i32
    %c0_i32_0 = arith.constant 0 : i32
    %c0_i32_1 = arith.constant 0 : i32
    return %c0_i32, %c0_i32_0 : i32, i32
  }
  func.func @transform_3(%arg0: i32) -> (i32, i32) {
    %c0_i32 = arith.constant 0 : i32
    %c0_i32_0 = arith.constant 0 : i32
    %c0_i32_1 = arith.constant 0 : i32
    return %c0_i32, %c0_i32_0 : i32, i32
  }
  func.func @transform_4(%arg0: i32) -> (i32, i32) {
    %c0_i32 = arith.constant 0 : i32
    %c0_i32_0 = arith.constant 0 : i32
    %c0_i32_1 = arith.constant 0 : i32
    return %c0_i32, %c0_i32_0 : i32, i32
  }
  func.func @transform_5(%arg0: i32) -> (i32, i32) {
    %c0_i32 = arith.constant 0 : i32
    %c0_i32_0 = arith.constant 0 : i32
    return %arg0, %c0_i32 : i32, i32
  }
}

module attributes {stable_mosaic.version = 11 : i64} {
  func.func @mgc_kernel(%arg0: i32, %arg1: memref<16x128xbf16, #tpu.memory_space<vmem>>, %arg2: memref<128x128xbf16, #tpu.memory_space<vmem>>, %arg3: memref<1x128xf32, #tpu.memory_space<vmem>>, %arg4: memref<128x128xbf16, #tpu.memory_space<vmem>>, %arg5: memref<1x128xf32, #tpu.memory_space<vmem>>, %arg6: memref<16x128xf32, #tpu.memory_space<vmem>>) attributes {dimension_semantics = [#tpu.dimension_semantics<parallel>], iteration_bounds = array<i64: 1>, scalar_prefetch = 0 : i64, scratch_operands = 0 : i64, tpu.core_type = #tpu.core_type<tc>, window_params = [{transform_indices = @transform_0, window_bounds = array<i64: 16, 128>}, {pipeline_mode = #tpu.pipeline_mode<synchronous>, transform_indices = @transform_1, window_bounds = array<i64: 128, 128>}, {pipeline_mode = #tpu.pipeline_mode<synchronous>, transform_indices = @transform_2, window_bounds = array<i64: 1, 128>}, {pipeline_mode = #tpu.pipeline_mode<synchronous>, transform_indices = @transform_3, window_bounds = array<i64: 128, 128>}, {pipeline_mode = #tpu.pipeline_mode<synchronous>, transform_indices = @transform_4, window_bounds = array<i64: 1, 128>}, {transform_indices = @transform_5, window_bounds = array<i64: 16, 128>}]} {
    %c0 = arith.constant 0 : index
    %c0_0 = arith.constant 0 : index
    %0 = vector.load %arg1[%c0, %c0_0] : memref<16x128xbf16, #tpu.memory_space<vmem>>, vector<16x128xbf16>
    %c0_1 = arith.constant 0 : index
    %c0_2 = arith.constant 0 : index
    %1 = vector.load %arg2[%c0_1, %c0_2] : memref<128x128xbf16, #tpu.memory_space<vmem>>, vector<128x128xbf16>
    %cst = arith.constant dense<0.000000e+00> : vector<16x128xf32>
    %2 = tpu.matmul %0, %1, %cst {dimension_numbers = #tpu.dot_dimension_numbers<[1], [0], [0], [1], [0, 0, 1, 1], [], []>} : vector<16x128xbf16>, vector<128x128xbf16>, vector<16x128xf32> -> vector<16x128xf32>
    %c0_3 = arith.constant 0 : index
    %c0_4 = arith.constant 0 : index
    %3 = vector.load %arg3[%c0_3, %c0_4] : memref<1x128xf32, #tpu.memory_space<vmem>>, vector<1x128xf32>
    %4 = vector.broadcast %3 : vector<1x128xf32> to vector<16x128xf32>
    %5 = arith.addf %2, %4 : vector<16x128xf32>
    %6 = arith.mulf %5, %5 : vector<16x128xf32>
    %cst_5 = arith.constant 0.797884583 : f32
    %7 = vector.broadcast %cst_5 : f32 to vector<16x128xf32>
    %8 = arith.mulf %7, %5 : vector<16x128xf32>
    %cst_6 = arith.constant 4.471500e-02 : f32
    %9 = vector.broadcast %cst_6 : f32 to vector<16x128xf32>
    %10 = arith.mulf %9, %6 : vector<16x128xf32>
    %cst_7 = arith.constant 1.000000e+00 : f32
    %11 = vector.broadcast %cst_7 : f32 to vector<16x128xf32>
    %12 = arith.addf %11, %10 : vector<16x128xf32>
    %13 = arith.mulf %8, %12 : vector<16x128xf32>
    %cst_8 = arith.constant 5.000000e-01 : f32
    %14 = vector.broadcast %cst_8 : f32 to vector<16x128xf32>
    %15 = arith.mulf %14, %5 : vector<16x128xf32>
    %16 = math.tanh %13 : vector<16x128xf32>
    %cst_9 = arith.constant 1.000000e+00 : f32
    %17 = vector.broadcast %cst_9 : f32 to vector<16x128xf32>
    %18 = arith.addf %17, %16 : vector<16x128xf32>
    %19 = arith.mulf %15, %18 : vector<16x128xf32>
    %20 = arith.truncf %19 : vector<16x128xf32> to vector<16x128xbf16>
    %c0_10 = arith.constant 0 : index
    %c0_11 = arith.constant 0 : index
    %21 = vector.load %arg4[%c0_10, %c0_11] : memref<128x128xbf16, #tpu.memory_space<vmem>>, vector<128x128xbf16>
    %cst_12 = arith.constant dense<0.000000e+00> : vector<16x128xf32>
    %22 = tpu.matmul %20, %21, %cst_12 {dimension_numbers = #tpu.dot_dimension_numbers<[1], [0], [0], [1], [0, 0, 1, 1], [], []>} : vector<16x128xbf16>, vector<128x128xbf16>, vector<16x128xf32> -> vector<16x128xf32>
    %c0_13 = arith.constant 0 : index
    %c0_14 = arith.constant 0 : index
    %23 = vector.load %arg5[%c0_13, %c0_14] : memref<1x128xf32, #tpu.memory_space<vmem>>, vector<1x128xf32>
    %24 = vector.broadcast %23 : vector<1x128xf32> to vector<16x128xf32>
    %25 = arith.addf %22, %24 : vector<16x128xf32>
    %cst_15 = arith.constant dense<0xFF800000> : vector<16xf32>
    %26 = vector.multi_reduction <maximumf>, %25, %cst_15 [1] : vector<16x128xf32> to vector<16xf32>
    %27 = vector.shape_cast %26 : vector<16xf32> to vector<16x1xf32>
    %28 = vector.broadcast %27 : vector<16x1xf32> to vector<16x128xf32>
    %29 = arith.subf %25, %28 : vector<16x128xf32>
    %30 = math.exp %29 : vector<16x128xf32>
    %cst_16 = arith.constant dense<0.000000e+00> : vector<16xf32>
    %31 = vector.multi_reduction <add>, %30, %cst_16 [1] : vector<16x128xf32> to vector<16xf32>
    %32 = vector.shape_cast %31 : vector<16xf32> to vector<16x1xf32>
    %33 = math.log %32 : vector<16x1xf32>
    %34 = vector.broadcast %33 : vector<16x1xf32> to vector<16x128xf32>
    %35 = arith.subf %29, %34 : vector<16x128xf32>
    %c0_17 = arith.constant 0 : index
    %c0_18 = arith.constant 0 : index
    %36 = vector.load %arg6[%c0_17, %c0_18] : memref<16x128xf32, #tpu.memory_space<vmem>>, vector<16x128xf32>
    tpu.vector_store %arg6[%c0_17, %c0_18], %35 {strides = array<i32>} : memref<16x128xf32, #tpu.memory_space<vmem>>, vector<16x128xf32>,
    return
  }
  func.func @transform_0(%arg0: i32) -> (i32, i32) {
    %c0_i32 = arith.constant 0 : i32
    %c0_i32_0 = arith.constant 0 : i32
    return %arg0, %c0_i32 : i32, i32
  }
  func.func @transform_1(%arg0: i32) -> (i32, i32) {
    %c0_i32 = arith.constant 0 : i32
    %c0_i32_0 = arith.constant 0 : i32
    %c0_i32_1 = arith.constant 0 : i32
    return %c0_i32, %c0_i32_0 : i32, i32
  }
  func.func @transform_2(%arg0: i32) -> (i32, i32) {
    %c0_i32 = arith.constant 0 : i32
    %c0_i32_0 = arith.constant 0 : i32
    %c0_i32_1 = arith.constant 0 : i32
    return %c0_i32, %c0_i32_0 : i32, i32
  }
  func.func @transform_3(%arg0: i32) -> (i32, i32) {
    %c0_i32 = arith.constant 0 : i32
    %c0_i32_0 = arith.constant 0 : i32
    %c0_i32_1 = arith.constant 0 : i32
    return %c0_i32, %c0_i32_0 : i32, i32
  }
  func.func @transform_4(%arg0: i32) -> (i32, i32) {
    %c0_i32 = arith.constant 0 : i32
    %c0_i32_0 = arith.constant 0 : i32
    %c0_i32_1 = arith.constant 0 : i32
    return %c0_i32, %c0_i32_0 : i32, i32
  }
  func.func @transform_5(%arg0: i32) -> (i32, i32) {
    %c0_i32 = arith.constant 0 : i32
    %c0_i32_0 = arith.constant 0 : i32
    return %arg0, %c0_i32 : i32, i32
  }
}

</mosaic_0001>

<bundles_post_ra>
// kernel: fwd.1
= control target key start
LH: loop header
LB: loop body
LE: loop exit
PB: predicated region body
PF: predicated region fallthrough
CT: control target
= control target key end

     0   :  { %10 = vsyncpa [#allocation3], 0  ;;  %s563_s0 = inlined_call_operand.vmem [shape: bf16[16,128], index: 0, kind: input, shape index: {}]   ;;  %s564_s1 = inlined_call_operand.hbm [shape: bf16[128,128], index: 1, kind: input, shape index: {}]   ;;  %s565_s2 = inlined_call_operand.vmem [shape: f32[1,128], index: 2, kind: input, shape index: {}]   ;;  %s566_s3 = inlined_call_operand.hbm [shape: bf16[128,128], index: 3, kind: input, shape index: {}]   ;;  %s567_s4 = inlined_call_operand.vmem [shape: f32[1,128], index: 4, kind: input, shape index: {}]   ;;  %s568_s5 = inlined_call_operand.vmem [shape: f32[16,128], index: 5, kind: output, shape index: {}]  }
   0x1   :  { %11 = vsyncpa [#allocation5], 0  ;;  %s488_s18 = smov [#allocation2]   ;;  %s440_s22 = scalar_lea.hbm %s564_s1, 1024 }
   0x2   :  { %s19_s19 = sshll.u32 %s488_s18, 4  ;;  %p441_p0 = scmp.ne.s32.totalorder %s564_s1, %s440_s22  ;;  %s20_s19 = int_to_ptr.vmem [resolvable:$true] %s19_s19 }
   0x3   :  { %p444_p1 = scmp.lt.u32.totalorder %s440_s22, %s564_s1 }
   0x5   :  { %p446_p2 = pnand %p444_p1, %p441_p0 }
   0x7   :  { %449 = shalt.err (!%p446_p2)
}
   0x8   :  { %s450_s27 = scalar_lea.vmem %s20_s19, 1024  ;;  %p455_p4 = scmp.lt.s32.totalorder %s20_s19, %s20_s19 }
   0x9   :  { %p451_p3 = scmp.ne.s32.totalorder %s20_s19, %s450_s27  ;;  %p456_p5 = scmp.lt.s32.totalorder %s450_s27, %s450_s27 }
   0xb   :  { %p457_p6 = por %p456_p5, %p455_p4 }
   0xd   :  { %p458_p7 = pnand %p457_p6, %p451_p3 }
   0xf   :  { %461 = shalt.err (!%p458_p7)
}
  0x10   :  { %s489_s28 = smov 64   ;;  %s490_s29 = smov 4  }
  0x11   :  { %25 = dma.hbm_to_vmem [thread:$0]  %s564_s1, 1024, %s20_s19, [#allocation3], %s489_s28, %s489_s28, %s490_s29  }
  0x12   :  { %s491_s7 = smov [#allocation4]   ;;  %s462_s11 = scalar_lea.hbm %s566_s3, 1024 }
  0x13   :  { %s33_s8 = sshll.u32 %s491_s7, 4  ;;  %p463_p8 = scmp.ne.s32.totalorder %s566_s3, %s462_s11  ;;  %s34_s8 = int_to_ptr.vmem [resolvable:$true] %s33_s8 }
  0x14   :  { %p466_p9 = scmp.lt.u32.totalorder %s462_s11, %s566_s3 }
  0x16   :  { %p468_p10 = pnand %p466_p9, %p463_p8 }
  0x18   :  { %471 = shalt.err (!%p468_p10)
}
  0x19   :  { %s472_s16 = scalar_lea.vmem %s34_s8, 1024  ;;  %p477_p12 = scmp.lt.s32.totalorder %s34_s8, %s34_s8 }
  0x1a   :  { %p473_p11 = scmp.ne.s32.totalorder %s34_s8, %s472_s16  ;;  %p478_p13 = scmp.lt.s32.totalorder %s472_s16, %s472_s16 }
  0x1c   :  { %p479_p0 = por %p478_p13, %p477_p12 }
  0x1e   :  { %p480_p1 = pnand %p479_p0, %p473_p11 }
  0x20   :  { %483 = shalt.err (!%p480_p1)
}
  0x21   :  { %39 = dma.hbm_to_vmem [thread:$0]  %s566_s3, 1024, %s34_s8, [#allocation5], %s489_s28, %s489_s28, %s490_s29  }
  0x22   :  { %484 = dma.done.wait [#allocation3], 1024  }
  0x23   :  { %485 = vsyncadd [#allocation3], 4294966272 }
  0x24   :  { %486 = dma.done.wait [#allocation5], 1024  }
  0x25   :  { %487 = vsyncadd [#allocation5], 4294966272  ;;  %v492_v0 = vmov 0.0   ;;  %vm493_vm0 = vmmov 0   ;;  %v411_v1 = vld [vmem:[#allocation2] sm:$0xff]   ;;  %v412_v2 = vld [vmem:[#allocation2 + $0x8] sm:$0xff]  }
  0x26   :  { %365 = vmatprep.subr.bf16.mxu0 %v492_v0  ;;  %381 = vmatprep.mubr.msk.bf16.mxu0 %vm493_vm0, %v492_v0  ;;  %v413_v3 = vld [vmem:[#allocation2 + $0x10] sm:$0xff]   ;;  %v420_v4 = vld [vmem:[#allocation4] sm:$0xff]   ;;  %v414_v5 = vld [vmem:[#allocation2 + $0x18] sm:$0xff]  }
  0x27   :  { %385 = vmatprep.subr.bf16.mxu1 %v492_v0  ;;  %401 = vmatprep.mubr.msk.bf16.mxu1 %vm493_vm0, %v492_v0  ;;  %v415_v6 = vld [vmem:[#allocation2 + $0x20] sm:$0xff]   ;;  %v416_v7 = vld [vmem:[#allocation2 + $0x28] sm:$0xff]   ;;  %v417_v8 = vld [vmem:[#allocation2 + $0x30] sm:$0xff]  }
  0x28   :  { %366 = vmatpush3.bf16.msra.mxu0 %v411_v1  ;;  %386 = vmatpush3.bf16.msra.mxu1 %v420_v4  ;;  %v418_v9 = vld [vmem:[#allocation2 + $0x38] sm:$0xff]   ;;  %v419_v10 = vld [vmem:[%s563_s0] sm:$0xff]   ;;  %v421_v11 = vld [vmem:[#allocation4 + $0x8] sm:$0xff]  }
  0x29   :  { %367 = vmatprep.subr.bf16.mxu0 %v492_v0  ;;  %387 = vmatprep.subr.bf16.mxu1 %v492_v0  ;;  %v422_v12 = vld [vmem:[#allocation4 + $0x10] sm:$0xff]   ;;  %v423_v13 = vld [vmem:[#allocation4 + $0x18] sm:$0xff]   ;;  %v424_v14 = vld [vmem:[#allocation4 + $0x20] sm:$0xff]  }
  0x2a   :  { %v425_v15 = vld [vmem:[#allocation4 + $0x28] sm:$0xff]   ;;  %v426_v16 = vld [vmem:[#allocation4 + $0x30] sm:$0xff]   ;;  %v427_v17 = vld [vmem:[#allocation4 + $0x38] sm:$0xff]  }
  0x2b   :  { %v328_v18 = vld [vmem:[%s565_s2] ss:$0 sm:$0xff] }
  0x2c   :  { %368 = vmatpush3.bf16.msra.mxu0 %v412_v2  ;;  %388 = vmatpush3.bf16.msra.mxu1 %v421_v11  ;;  %v338_v44 = vld [vmem:[%s567_s4] ss:$0 sm:$0xff] }
  0x2d   :  { %369 = vmatprep.subr.bf16.mxu0 %v492_v0  ;;  %389 = vmatprep.subr.bf16.mxu1 %v492_v0 }
  0x30   :  { %370 = vmatpush3.bf16.msra.mxu0 %v413_v3  ;;  %390 = vmatpush3.bf16.msra.mxu1 %v422_v12 }
  0x31   :  { %371 = vmatprep.subr.bf16.mxu0 %v492_v0  ;;  %391 = vmatprep.subr.bf16.mxu1 %v492_v0 }
  0x34   :  { %372 = vmatpush3.bf16.msra.mxu0 %v414_v5  ;;  %392 = vmatpush3.bf16.msra.mxu1 %v423_v13 }
  0x35   :  { %373 = vmatprep.subr.bf16.mxu0 %v492_v0  ;;  %393 = vmatprep.subr.bf16.mxu1 %v492_v0 }
  0x38   :  { %374 = vmatpush3.bf16.msra.mxu0 %v415_v6  ;;  %394 = vmatpush3.bf16.msra.mxu1 %v424_v14 }
  0x39   :  { %375 = vmatprep.subr.bf16.mxu0 %v492_v0  ;;  %395 = vmatprep.subr.bf16.mxu1 %v492_v0 }
  0x3c   :  { %376 = vmatpush3.bf16.msra.mxu0 %v416_v7  ;;  %396 = vmatpush3.bf16.msra.mxu1 %v425_v15 }
  0x3d   :  { %377 = vmatprep.subr.bf16.mxu0 %v492_v0  ;;  %397 = vmatprep.subr.bf16.mxu1 %v492_v0 }
  0x40   :  { %378 = vmatpush3.bf16.msra.mxu0 %v417_v8  ;;  %398 = vmatpush3.bf16.msra.mxu1 %v426_v16 }
  0x41   :  { %379 = vmatprep.subr.bf16.mxu0 %v492_v0  ;;  %399 = vmatprep.subr.bf16.mxu1 %v492_v0 }
  0x44   :  { %380 = vmatpush3.bf16.msra.mxu0 %v418_v9  ;;  %400 = vmatpush3.bf16.msra.mxu1 %v427_v17 }
  0x47   :  { %382 = vmatmul.mubr.bf16.vlgmr.msra.gmra.mrb[0].mxu0 %v419_v10 }
 0x11a   :  { %v162_v19 = vpop.f32.mrb[0].mxu0 }
 0x11b   :  { %v163_v20 = vadd.f32 %v328_v18, %v162_v19  ;;  %v383_v21 = vpop.f32.mrb[1].mxu0 }
 0x11c   :  { %v165_v22 = vpop.f32.mrb[2].mxu0 }
 0x11d   :  { %v169_v23 = vmul.f32 %v163_v20, %v163_v20  ;;  %v166_v24 = vadd.f32 %v328_v18, %v165_v22  ;;  %v384_v25 = vpop.f32.mrb[3].mxu0  ;;  %v171_v28 = vmul.f32 0.7978846, %v163_v20  ;;  %v179_v38 = vmul.f32 0.5, %v163_v20 }
 0x11f   :  { %v173_v26 = vmul.f32 0.044715, %v169_v23  ;;  %v170_v27 = vmul.f32 %v166_v24, %v166_v24  ;;  %v172_v32 = vmul.f32 0.7978846, %v166_v24  ;;  %v180_v39 = vmul.f32 0.5, %v166_v24 }
 0x121   :  { %v175_v29 = vadd.f32 1.0, %v173_v26  ;;  %v174_v30 = vmul.f32 0.044715, %v170_v27 }
 0x123   :  { %v177_v31 = vmul.f32 %v175_v29, %v171_v28  ;;  %v176_v33 = vadd.f32 1.0, %v174_v30 }
 0x125   :  { %428 = vtanh.f32 %v177_v31  ;;  %v178_v34 = vmul.f32 %v176_v33, %v172_v32 }
 0x127   :  { %430 = vtanh.f32 %v178_v34 }
 0x12f   :  { %v429_v35 = vpop.eup %428 }
 0x130   :  { %v183_v36 = vadd.f32 1.0, %v429_v35 }
 0x131   :  { %v431_v37 = vpop.eup %430 }
 0x132   :  { %v184_v40 = vadd.f32 1.0, %v431_v37  ;;  %v185_v41 = vmul.f32 %v183_v36, %v179_v38 }
 0x134   :  { %v186_v42 = vmul.f32 %v184_v40, %v180_v39 }
 0x136   :  { %v187_v43 = vpack.c.bf16 %v186_v42, %v185_v41 }
 0x138   :  { %402 = vmatmul.mubr.bf16.vlgmr.msra.gmra.mrb[0].mxu1 %v187_v43 }
 0x20b   :  { %v293_v45 = vpop.f32.mrb[0].mxu1 }
 0x20c   :  { %v294_v46 = vadd.f32 %v338_v44, %v293_v45  ;;  %v403_v47 = vpop.f32.mrb[1].mxu1 }
 0x20d   :  { %v296_v48 = vpop.f32.mrb[2].mxu1 }
 0x20e   :  { %300 = vmax.xlane.f32.xlu0 %v294_v46  ;;  %v404_v49 = vpop.f32.mrb[3].mxu1  ;;  %v297_v50 = vadd.f32 %v338_v44, %v296_v48 }
 0x212   :  { %302 = vmax.xlane.f32.xlu0 %v297_v50 }
 0x29b   :  { %v301_v51 = vpop.xlane.xlu0 %300 }
 0x29c   :  { %v304_v52 = vsub.f32 %v294_v46, %v301_v51 }
 0x29e   :  { %v306_v53 = vmul.f32 1.442695, %v304_v52 }
 0x29f   :  { %v303_v54 = vpop.xlane.xlu0 %302 }
 0x2a0   :  { %v305_v55 = vsub.f32 %v297_v50, %v303_v54  ;;  %432 = vpow2.f32 %v306_v53 }
 0x2a2   :  { %v308_v56 = vmul.f32 1.442695, %v305_v55 }
 0x2a4   :  { %434 = vpow2.f32 %v308_v56 }
 0x2aa   :  { %v433_v57 = vpop.eup %432 }
 0x2ab   :  { %310 = vadd.xlane.f32.xlu1 %v433_v57 }
 0x2ae   :  { %v435_v58 = vpop.eup %434 }
 0x2af   :  { %312 = vadd.xlane.f32.xlu1 %v435_v58 }
 0x338   :  { %v311_v59 = vpop.xlane.xlu1 %310 }
 0x339   :  { %436 = vlog2.f32 %v311_v59 }
 0x33c   :  { %v313_v60 = vpop.xlane.xlu1 %312 }
 0x33d   :  { %438 = vlog2.f32 %v313_v60 }
 0x343   :  { %v437_v61 = vpop.eup %436 }
 0x344   :  { %v315_v62 = vmul.f32 0.6931472, %v437_v61 }
 0x346   :  { %v318_v63 = vsub.f32 %v304_v52, %v315_v62 }
 0x347   :  { %v439_v0 = vpop.eup %438 }
 0x348   :  { %320 = vst [vmem:[%s568_s5] sm:$0xff] %v318_v63  ;;  %v317_v1 = vmul.f32 0.6931472, %v439_v0 }
 0x34a   :  { %v319_v2 = vsub.f32 %v305_v55, %v317_v1 }
 0x34c   :  { %321 = vst [vmem:[%s568_s5 + $0x8] sm:$0xff] %v319_v2 }
 0x34d   :  { %326 = vsyncpa [#allocation3], 1 }
 0x34e   :  { %327 = vsyncpa [#allocation5], 1 }

// kernel: fwd.1
= control target key start
LH: loop header
LB: loop body
LE: loop exit
PB: predicated region body
PF: predicated region fallthrough
CT: control target
= control target key end

     0   :  { %10 = vsyncpa [#allocation3], 0  ;;  %s563_s0 = inlined_call_operand.vmem [shape: bf16[16,128], index: 0, kind: input, shape index: {}]   ;;  %s564_s1 = inlined_call_operand.hbm [shape: bf16[128,128], index: 1, kind: input, shape index: {}]   ;;  %s565_s2 = inlined_call_operand.vmem [shape: f32[1,128], index: 2, kind: input, shape index: {}]   ;;  %s566_s3 = inlined_call_operand.hbm [shape: bf16[128,128], index: 3, kind: input, shape index: {}]   ;;  %s567_s4 = inlined_call_operand.vmem [shape: f32[1,128], index: 4, kind: input, shape index: {}]   ;;  %s568_s5 = inlined_call_operand.vmem [shape: f32[16,128], index: 5, kind: output, shape index: {}]  }
   0x1   :  { %11 = vsyncpa [#allocation5], 0  ;;  %s488_s18 = smov [#allocation2]   ;;  %s440_s22 = scalar_lea.hbm %s564_s1, 1024 }
   0x2   :  { %s19_s19 = sshll.u32 %s488_s18, 4  ;;  %p441_p0 = scmp.ne.s32.totalorder %s564_s1, %s440_s22  ;;  %s20_s19 = int_to_ptr.vmem [resolvable:$true] %s19_s19 }
   0x3   :  { %p444_p1 = scmp.lt.u32.totalorder %s440_s22, %s564_s1 }
   0x5   :  { %p446_p2 = pnand %p444_p1, %p441_p0 }
   0x7   :  { %449 = shalt.err (!%p446_p2)
}
   0x8   :  { %s450_s27 = scalar_lea.vmem %s20_s19, 1024  ;;  %p455_p4 = scmp.lt.s32.totalorder %s20_s19, %s20_s19 }
   0x9   :  { %p451_p3 = scmp.ne.s32.totalorder %s20_s19, %s450_s27  ;;  %p456_p5 = scmp.lt.s32.totalorder %s450_s27, %s450_s27 }
   0xb   :  { %p457_p6 = por %p456_p5, %p455_p4 }
   0xd   :  { %p458_p7 = pnand %p457_p6, %p451_p3 }
   0xf   :  { %461 = shalt.err (!%p458_p7)
}
  0x10   :  { %s489_s28 = smov 64   ;;  %s490_s29 = smov 4  }
  0x11   :  { %25 = dma.hbm_to_vmem [thread:$0]  %s564_s1, 1024, %s20_s19, [#allocation3], %s489_s28, %s489_s28, %s490_s29  }
  0x12   :  { %s491_s7 = smov [#allocation4]   ;;  %s462_s11 = scalar_lea.hbm %s566_s3, 1024 }
  0x13   :  { %s33_s8 = sshll.u32 %s491_s7, 4  ;;  %p463_p8 = scmp.ne.s32.totalorder %s566_s3, %s462_s11  ;;  %s34_s8 = int_to_ptr.vmem [resolvable:$true] %s33_s8 }
  0x14   :  { %p466_p9 = scmp.lt.u32.totalorder %s462_s11, %s566_s3 }
  0x16   :  { %p468_p10 = pnand %p466_p9, %p463_p8 }
  0x18   :  { %471 = shalt.err (!%p468_p10)
}
  0x19   :  { %s472_s16 = scalar_lea.vmem %s34_s8, 1024  ;;  %p477_p12 = scmp.lt.s32.totalorder %s34_s8, %s34_s8 }
  0x1a   :  { %p473_p11 = scmp.ne.s32.totalorder %s34_s8, %s472_s16  ;;  %p478_p13 = scmp.lt.s32.totalorder %s472_s16, %s472_s16 }
  0x1c   :  { %p479_p0 = por %p478_p13, %p477_p12 }
  0x1e   :  { %p480_p1 = pnand %p479_p0, %p473_p11 }
  0x20   :  { %483 = shalt.err (!%p480_p1)
}
  0x21   :  { %39 = dma.hbm_to_vmem [thread:$0]  %s566_s3, 1024, %s34_s8, [#allocation5], %s489_s28, %s489_s28, %s490_s29  }
  0x22   :  { %484 = dma.done.wait [#allocation3], 1024  }
  0x23   :  { %485 = vsyncadd [#allocation3], 4294966272 }
  0x24   :  { %486 = dma.done.wait [#allocation5], 1024  }
  0x25   :  { %487 = vsyncadd [#allocation5], 4294966272  ;;  %v492_v0 = vmov 0.0   ;;  %vm493_vm0 = vmmov 0   ;;  %v411_v1 = vld [vmem:[#allocation2] sm:$0xff]   ;;  %v412_v2 = vld [vmem:[#allocation2 + $0x8] sm:$0xff]  }
  0x26   :  { %365 = vmatprep.subr.bf16.mxu0 %v492_v0  ;;  %381 = vmatprep.mubr.msk.bf16.mxu0 %vm493_vm0, %v492_v0  ;;  %v413_v3 = vld [vmem:[#allocation2 + $0x10] sm:$0xff]   ;;  %v420_v4 = vld [vmem:[#allocation4] sm:$0xff]   ;;  %v414_v5 = vld [vmem:[#allocation2 + $0x18] sm:$0xff]  }
  0x27   :  { %385 = vmatprep.subr.bf16.mxu1 %v492_v0  ;;  %401 = vmatprep.mubr.msk.bf16.mxu1 %vm493_vm0, %v492_v0  ;;  %v415_v6 = vld [vmem:[#allocation2 + $0x20] sm:$0xff]   ;;  %v416_v7 = vld [vmem:[#allocation2 + $0x28] sm:$0xff]   ;;  %v417_v8 = vld [vmem:[#allocation2 + $0x30] sm:$0xff]  }
  0x28   :  { %366 = vmatpush3.bf16.msra.mxu0 %v411_v1  ;;  %386 = vmatpush3.bf16.msra.mxu1 %v420_v4  ;;  %v418_v9 = vld [vmem:[#allocation2 + $0x38] sm:$0xff]   ;;  %v419_v10 = vld [vmem:[%s563_s0] sm:$0xff]   ;;  %v421_v11 = vld [vmem:[#allocation4 + $0x8] sm:$0xff]  }
  0x29   :  { %367 = vmatprep.subr.bf16.mxu0 %v492_v0  ;;  %387 = vmatprep.subr.bf16.mxu1 %v492_v0  ;;  %v422_v12 = vld [vmem:[#allocation4 + $0x10] sm:$0xff]   ;;  %v423_v13 = vld [vmem:[#allocation4 + $0x18] sm:$0xff]   ;;  %v424_v14 = vld [vmem:[#allocation4 + $0x20] sm:$0xff]  }
  0x2a   :  { %v425_v15 = vld [vmem:[#allocation4 + $0x28] sm:$0xff]   ;;  %v426_v16 = vld [vmem:[#allocation4 + $0x30] sm:$0xff]   ;;  %v427_v17 = vld [vmem:[#allocation4 + $0x38] sm:$0xff]  }
  0x2b   :  { %v328_v18 = vld [vmem:[%s565_s2] ss:$0 sm:$0xff] }
  0x2c   :  { %368 = vmatpush3.bf16.msra.mxu0 %v412_v2  ;;  %388 = vmatpush3.bf16.msra.mxu1 %v421_v11  ;;  %v338_v44 = vld [vmem:[%s567_s4] ss:$0 sm:$0xff] }
  0x2d   :  { %369 = vmatprep.subr.bf16.mxu0 %v492_v0  ;;  %389 = vmatprep.subr.bf16.mxu1 %v492_v0 }
  0x30   :  { %370 = vmatpush3.bf16.msra.mxu0 %v413_v3  ;;  %390 = vmatpush3.bf16.msra.mxu1 %v422_v12 }
  0x31   :  { %371 = vmatprep.subr.bf16.mxu0 %v492_v0  ;;  %391 = vmatprep.subr.bf16.mxu1 %v492_v0 }
  0x34   :  { %372 = vmatpush3.bf16.msra.mxu0 %v414_v5  ;;  %392 = vmatpush3.bf16.msra.mxu1 %v423_v13 }
  0x35   :  { %373 = vmatprep.subr.bf16.mxu0 %v492_v0  ;;  %393 = vmatprep.subr.bf16.mxu1 %v492_v0 }
  0x38   :  { %374 = vmatpush3.bf16.msra.mxu0 %v415_v6  ;;  %394 = vmatpush3.bf16.msra.mxu1 %v424_v14 }
  0x39   :  { %375 = vmatprep.subr.bf16.mxu0 %v492_v0  ;;  %395 = vmatprep.subr.bf16.mxu1 %v492_v0 }
  0x3c   :  { %376 = vmatpush3.bf16.msra.mxu0 %v416_v7  ;;  %396 = vmatpush3.bf16.msra.mxu1 %v425_v15 }
  0x3d   :  { %377 = vmatprep.subr.bf16.mxu0 %v492_v0  ;;  %397 = vmatprep.subr.bf16.mxu1 %v492_v0 }
  0x40   :  { %378 = vmatpush3.bf16.msra.mxu0 %v417_v8  ;;  %398 = vmatpush3.bf16.msra.mxu1 %v426_v16 }
  0x41   :  { %379 = vmatprep.subr.bf16.mxu0 %v492_v0  ;;  %399 = vmatprep.subr.bf16.mxu1 %v492_v0 }
  0x44   :  { %380 = vmatpush3.bf16.msra.mxu0 %v418_v9  ;;  %400 = vmatpush3.bf16.msra.mxu1 %v427_v17 }
  0x47   :  { %382 = vmatmul.mubr.bf16.vlgmr.msra.gmra.mrb[0].mxu0 %v419_v10 }
 0x11a   :  { %v162_v19 = vpop.f32.mrb[0].mxu0 }
 0x11b   :  { %v163_v20 = vadd.f32 %v328_v18, %v162_v19  ;;  %v383_v21 = vpop.f32.mrb[1].mxu0 }
 0x11c   :  { %v165_v22 = vpop.f32.mrb[2].mxu0 }
 0x11d   :  { %v169_v23 = vmul.f32 %v163_v20, %v163_v20  ;;  %v166_v24 = vadd.f32 %v328_v18, %v165_v22  ;;  %v384_v25 = vpop.f32.mrb[3].mxu0  ;;  %v171_v28 = vmul.f32 0.7978846, %v163_v20  ;;  %v179_v38 = vmul.f32 0.5, %v163_v20 }
 0x11f   :  { %v173_v26 = vmul.f32 0.044715, %v169_v23  ;;  %v170_v27 = vmul.f32 %v166_v24, %v166_v24  ;;  %v172_v32 = vmul.f32 0.7978846, %v166_v24  ;;  %v180_v39 = vmul.f32 0.5, %v166_v24 }
 0x121   :  { %v175_v29 = vadd.f32 1.0, %v173_v26  ;;  %v174_v30 = vmul.f32 0.044715, %v170_v27 }
 0x123   :  { %v177_v31 = vmul.f32 %v175_v29, %v171_v28  ;;  %v176_v33 = vadd.f32 1.0, %v174_v30 }
 0x125   :  { %428 = vtanh.f32 %v177_v31  ;;  %v178_v34 = vmul.f32 %v176_v33, %v172_v32 }
 0x127   :  { %430 = vtanh.f32 %v178_v34 }
 0x12f   :  { %v429_v35 = vpop.eup %428 }
 0x130   :  { %v183_v36 = vadd.f32 1.0, %v429_v35 }
 0x131   :  { %v431_v37 = vpop.eup %430 }
 0x132   :  { %v184_v40 = vadd.f32 1.0, %v431_v37  ;;  %v185_v41 = vmul.f32 %v183_v36, %v179_v38 }
 0x134   :  { %v186_v42 = vmul.f32 %v184_v40, %v180_v39 }
 0x136   :  { %v187_v43 = vpack.c.bf16 %v186_v42, %v185_v41 }
 0x138   :  { %402 = vmatmul.mubr.bf16.vlgmr.msra.gmra.mrb[0].mxu1 %v187_v43 }
 0x20b   :  { %v293_v45 = vpop.f32.mrb[0].mxu1 }
 0x20c   :  { %v294_v46 = vadd.f32 %v338_v44, %v293_v45  ;;  %v403_v47 = vpop.f32.mrb[1].mxu1 }
 0x20d   :  { %v296_v48 = vpop.f32.mrb[2].mxu1 }
 0x20e   :  { %300 = vmax.xlane.f32.xlu0 %v294_v46  ;;  %v404_v49 = vpop.f32.mrb[3].mxu1  ;;  %v297_v50 = vadd.f32 %v338_v44, %v296_v48 }
 0x212   :  { %302 = vmax.xlane.f32.xlu0 %v297_v50 }
 0x29b   :  { %v301_v51 = vpop.xlane.xlu0 %300 }
 0x29c   :  { %v304_v52 = vsub.f32 %v294_v46, %v301_v51 }
 0x29e   :  { %v306_v53 = vmul.f32 1.442695, %v304_v52 }
 0x29f   :  { %v303_v54 = vpop.xlane.xlu0 %302 }
 0x2a0   :  { %v305_v55 = vsub.f32 %v297_v50, %v303_v54  ;;  %432 = vpow2.f32 %v306_v53 }
 0x2a2   :  { %v308_v56 = vmul.f32 1.442695, %v305_v55 }
 0x2a4   :  { %434 = vpow2.f32 %v308_v56 }
 0x2aa   :  { %v433_v57 = vpop.eup %432 }
 0x2ab   :  { %310 = vadd.xlane.f32.xlu1 %v433_v57 }
 0x2ae   :  { %v435_v58 = vpop.eup %434 }
 0x2af   :  { %312 = vadd.xlane.f32.xlu1 %v435_v58 }
 0x338   :  { %v311_v59 = vpop.xlane.xlu1 %310 }
 0x339   :  { %436 = vlog2.f32 %v311_v59 }
 0x33c   :  { %v313_v60 = vpop.xlane.xlu1 %312 }
 0x33d   :  { %438 = vlog2.f32 %v313_v60 }
 0x343   :  { %v437_v61 = vpop.eup %436 }
 0x344   :  { %v315_v62 = vmul.f32 0.6931472, %v437_v61 }
 0x346   :  { %v318_v63 = vsub.f32 %v304_v52, %v315_v62 }
 0x347   :  { %v439_v0 = vpop.eup %438 }
 0x348   :  { %320 = vst [vmem:[%s568_s5] sm:$0xff] %v318_v63  ;;  %v317_v1 = vmul.f32 0.6931472, %v439_v0 }
 0x34a   :  { %v319_v2 = vsub.f32 %v305_v55, %v317_v1 }
 0x34c   :  { %321 = vst [vmem:[%s568_s5 + $0x8] sm:$0xff] %v319_v2 }
 0x34d   :  { %326 = vsyncpa [#allocation3], 1 }
 0x34e   :  { %327 = vsyncpa [#allocation5], 1 }

</bundles_post_ra>
